<compile_context>
chip_gen: v7x
topology: tpu7x:2x2x1
jax: 0.10.0
libtpu: 0.0.40
codegen_flags: <defaults>
</compile_context>

<pallas_src>
import functools

import jax
import jax.numpy as jnp
from jax.experimental import pallas as pl
from jax.experimental.pallas import tpu as pltpu


def _label_smooth_kernel(x_ref, tgt_ref, cw_ref, out_ref, *, smoothing, n_total):
    i = pl.program_id(0)

    x = x_ref[...].astype(jnp.float32)            # (TN, C) f32 (cast after DMA)
    tn, c = x.shape

    # log-softmax along the class (lane) axis
    m = jnp.max(x, axis=-1, keepdims=True)
    shifted = x - m
    lse = jnp.log(jnp.sum(jnp.exp(shifted), axis=-1, keepdims=True))
    log_p = shifted - lse                         # (TN, C)

    cw = cw_ref[...].astype(jnp.float32)          # (1, C), resident across grid
    on_w = cw * jnp.float32(1.0 - smoothing)
    off_val = smoothing / (c - 1.0) if c > 1 else 0.0
    off_w = cw * jnp.float32(off_val)

    # Smoothed one-hot weights without materializing the weight matrix in HBM:
    # a single select between two (1, C) rows, broadcast vs (TN, 1) targets.
    cls_idx = jax.lax.broadcasted_iota(jnp.int32, (1, c), 1)   # (1, C) lane iota
    tgt = tgt_ref[...]                            # (TN, 1) int32
    w = jnp.where(cls_idx == tgt, on_w, off_w)    # (TN, C)

    per_row = -jnp.sum(w * log_p, axis=-1, keepdims=True)      # (TN, 1)

    # Mask rows past the true batch size (last-tile padding reads garbage HBM;
    # keep this a SELECT so inf/NaN in padded rows cannot poison the sum).
    row_idx = i * tn + jax.lax.broadcasted_iota(jnp.int32, (tn, 1), 0)
    per_row = jnp.where(row_idx < n_total, per_row, 0.0)

    # Lane-dense per-tile partial (unmasked vst); wrapper reduces [i, 0, 0].
    out_ref[...] = jnp.full(out_ref.shape, jnp.sum(per_row), dtype=jnp.float32)


def _vmem_budget():
    """Generation-aware (vmem_limit_bytes, per-tile working-set budget)."""
    try:
        cap = int(pltpu.get_tpu_info().vmem_capacity_bytes)
    except Exception:  # interpret mode / older jax: assume smallest (v7x per-TC)
        cap = 64 * 1024 * 1024
    if cap >= 96 * 1024 * 1024:
        # v5e / v6e: 128 MiB physical VMEM — large tiles, generous limit.
        return 96 * 1024 * 1024, 48 * 1024 * 1024
    # v7x: 64 MiB per TC (two cores resident) — budget tightly but not tiny.
    return 48 * 1024 * 1024, 26 * 1024 * 1024


def _pick_tile_rows(n, c, itemsize, tile_budget):
    # Working set per tile element ≈ 2 pipelined input buffers (native dtype)
    # + ~6 f32 full-tile temporaries (shifted / exp / log_p / mask / w / w*log_p).
    bytes_per_elem = 2 * itemsize + 24
    tn = tile_budget // max(1, c * bytes_per_elem)
    tn = max(16, (tn // 16) * 16)                 # sublane-aligned for bf16/f32
    # TODO(synk): for vocab-scale C where even a 16-row tile blows the budget,
    # tile the class axis as well with an online (flash-style) max/logsumexp.
    return n if n <= tn else tn


def label_smooth_loss(logits, target, class_weight, smoothing=0.1,
                      tile_rows=None):
    """logits: (N, C) f32/bf16, target: (N,) int, class_weight: (C,) float."""
    n, c = logits.shape
    tgt2d = target.astype(jnp.int32).reshape(n, 1)
    cw2d = class_weight.astype(jnp.float32).reshape(1, c)

    vmem_limit, tile_budget = _vmem_budget()
    if tile_rows is None:
        tile_rows = _pick_tile_rows(n, c, jnp.dtype(logits.dtype).itemsize,
                                    tile_budget)
    tn = n if n <= tile_rows else tile_rows
    num_tiles = pl.cdiv(n, tn)

    kernel = functools.partial(_label_smooth_kernel,
                               smoothing=float(smoothing), n_total=n)

    partials = pl.pallas_call(
        kernel,
        out_shape=jax.ShapeDtypeStruct((num_tiles, 8, 128), jnp.float32),
        grid=(num_tiles,),
        in_specs=[
            pl.BlockSpec((tn, c), lambda i: (i, 0)),   # logits: streamed tiles
            pl.BlockSpec((tn, 1), lambda i: (i, 0)),   # targets: streamed tiles
            pl.BlockSpec((1, c), lambda i: (0, 0)),    # class weights: resident
        ],
        out_specs=pl.BlockSpec((1, 8, 128), lambda i: (i, 0, 0)),
        compiler_params=pltpu.CompilerParams(
            dimension_semantics=("parallel",),         # tiles split across TCs
            vmem_limit_bytes=vmem_limit,
        ),
    )(logits, tgt2d, cw2d)

    # Tiny final reduce + hoisted normalization in the wrapper.
    total = jnp.sum(partials[:, 0, 0])
    cw_mean = jnp.mean(cw2d)
    return total / (cw_mean * jnp.float32(n))


if __name__ == "__main__":
    key = jax.random.PRNGKey(0)
    k1, k2, k3 = jax.random.split(key, 3)

    smoothing = 0.1

    def reference(lg, tg, cw):
        nn, cc = lg.shape
        log_prob = jax.nn.log_softmax(lg.astype(jnp.float32), axis=-1)
        w = jnp.full((nn, cc), smoothing / (cc - 1.0), dtype=jnp.float32)
        w = w.at[jnp.arange(nn), tg].set(1.0 - smoothing)
        loss = (-w * log_prob * cw[None, :].astype(jnp.float32)).sum(-1).mean()
        return loss / jnp.mean(cw.astype(jnp.float32))

    # small shapes consistent with the module
    N, C = 8, 32
    logits = jax.random.normal(k1, (N, C), dtype=jnp.float32)
    target = jax.random.randint(k2, (N,), 0, C, dtype=jnp.int32)
    class_weight = jax.random.uniform(k3, (C,), dtype=jnp.float32,
                                      minval=0.5, maxval=1.5)

    loss = label_smooth_loss(logits, target, class_weight, smoothing)
    jax.block_until_ready(loss)
    ref = reference(logits, target, class_weight)
    assert jnp.allclose(loss, ref, atol=1e-5, rtol=1e-5), (loss, ref)

    # multi-tile path (grid > 1, parallel tiles, last tile row-masked)
    k4, k5 = jax.random.split(k1)
    N2 = 40
    logits2 = jax.random.normal(k4, (N2, C), dtype=jnp.float32)
    target2 = jax.random.randint(k5, (N2,), 0, C, dtype=jnp.int32)
    loss2 = label_smooth_loss(logits2, target2, class_weight, smoothing,
                              tile_rows=16)
    jax.block_until_ready(loss2)
    ref2 = reference(logits2, target2, class_weight)
    assert jnp.allclose(loss2, ref2, atol=1e-5, rtol=1e-5), (loss2, ref2)

    # bf16 logits path (halved HBM traffic; f32 math inside the kernel)
    logits_bf16 = logits.astype(jnp.bfloat16)
    loss3 = label_smooth_loss(logits_bf16, target, class_weight, smoothing)
    jax.block_until_ready(loss3)
    ref3 = reference(logits_bf16, target, class_weight)
    assert jnp.allclose(loss3, ref3, atol=1e-4, rtol=1e-4), (loss3, ref3)

    print("KERNEL_OK")
</pallas_src>

<mosaic_0001>
module attributes {stable_mosaic.version = 11 : i64} {
  func.func @_label_smooth_kernel(%arg0: i32, %arg1: memref<8x32xf32, #tpu.memory_space<vmem>>, %arg2: memref<8x1xi32, #tpu.memory_space<vmem>>, %arg3: memref<1x32xf32, #tpu.memory_space<vmem>>, %arg4: memref<1x8x128xf32, #tpu.memory_space<vmem>>) attributes {dimension_semantics = [#tpu.dimension_semantics<parallel>], iteration_bounds = array<i64: 1>, scalar_prefetch = 0 : i64, scratch_operands = 0 : i64, tpu.core_type = #tpu.core_type<tc>, window_params = [{transform_indices = @transform_0, window_bounds = array<i64: 8, 32>}, {transform_indices = @transform_1, window_bounds = array<i64: 8, 1>}, {pipeline_mode = #tpu.pipeline_mode<synchronous>, transform_indices = @transform_2, window_bounds = array<i64: 1, 32>}, {transform_indices = @transform_3, window_bounds = array<i64: 1, 8, 128>}]} {
    %c0 = arith.constant 0 : index
    %c0_0 = arith.constant 0 : index
    %0 = vector.load %arg1[%c0, %c0_0] : memref<8x32xf32, #tpu.memory_space<vmem>>, vector<8x32xf32>
    %cst = arith.constant dense<0xFF800000> : vector<8xf32>
    %1 = vector.multi_reduction <maximumf>, %0, %cst [1] : vector<8x32xf32> to vector<8xf32>
    %2 = vector.shape_cast %1 : vector<8xf32> to vector<8x1xf32>
    %3 = vector.broadcast %2 : vector<8x1xf32> to vector<8x32xf32>
    %4 = arith.subf %0, %3 : vector<8x32xf32>
    %5 = math.exp %4 : vector<8x32xf32>
    %cst_1 = arith.constant dense<0.000000e+00> : vector<8xf32>
    %6 = vector.multi_reduction <add>, %5, %cst_1 [1] : vector<8x32xf32> to vector<8xf32>
    %7 = vector.shape_cast %6 : vector<8xf32> to vector<8x1xf32>
    %8 = math.log %7 : vector<8x1xf32>
    %9 = vector.broadcast %8 : vector<8x1xf32> to vector<8x32xf32>
    %10 = arith.subf %4, %9 : vector<8x32xf32>
    %c0_2 = arith.constant 0 : index
    %c0_3 = arith.constant 0 : index
    %11 = vector.load %arg3[%c0_2, %c0_3] : memref<1x32xf32, #tpu.memory_space<vmem>>, vector<1x32xf32>
    %cst_4 = arith.constant 0.899999976 : f32
    %12 = vector.broadcast %cst_4 : f32 to vector<1x32xf32>
    %13 = arith.mulf %11, %12 : vector<1x32xf32>
    %cst_5 = arith.constant 0.0032258064 : f32
    %14 = vector.broadcast %cst_5 : f32 to vector<1x32xf32>
    %15 = arith.mulf %11, %14 : vector<1x32xf32>
    %16 = tpu.iota {dimensions = array<i32: 1>} : vector<1x32xi32>
    %c0_6 = arith.constant 0 : index
    %c0_7 = arith.constant 0 : index
    %17 = vector.load %arg2[%c0_6, %c0_7] : memref<8x1xi32, #tpu.memory_space<vmem>>, vector<8x1xi32>
    %18 = vector.broadcast %16 : vector<1x32xi32> to vector<8x32xi32>
    %19 = vector.broadcast %17 : vector<8x1xi32> to vector<8x32xi32>
    %20 = arith.cmpi eq, %18, %19 : vector<8x32xi32>
    %21 = vector.shape_cast %13 : vector<1x32xf32> to vector<1x32xf32>
    %22 = vector.broadcast %21 : vector<1x32xf32> to vector<8x32xf32>
    %23 = vector.shape_cast %15 : vector<1x32xf32> to vector<1x32xf32>
    %24 = vector.broadcast %23 : vector<1x32xf32> to vector<8x32xf32>
    %25 = arith.select %20, %22, %24 : vector<8x32xi1>, vector<8x32xf32>
    %26 = arith.mulf %25, %10 : vector<8x32xf32>
    %cst_8 = arith.constant dense<0.000000e+00> : vector<8xf32>
    %27 = vector.multi_reduction <add>, %26, %cst_8 [1] : vector<8x32xf32> to vector<8xf32>
    %28 = vector.shape_cast %27 : vector<8xf32> to vector<8x1xf32>
    %cst_9 = arith.constant 0.000000e+00 : f32
    %29 = vector.broadcast %cst_9 : f32 to vector<8x1xf32>
    %30 = arith.subf %29, %28 : vector<8x1xf32>
    %c8_i32 = arith.constant 8 : i32
    %31 = arith.muli %arg0, %c8_i32 : i32
    %32 = tpu.iota {dimensions = array<i32: 0>} : vector<8x1xi32>
    %33 = vector.broadcast %31 : i32 to vector<8x1xi32>
    %34 = arith.addi %33, %32 : vector<8x1xi32>
    %c8_i32_10 = arith.constant 8 : i32
    %35 = vector.broadcast %c8_i32_10 : i32 to vector<8x1xi32>
    %36 = arith.cmpi slt, %34, %35 : vector<8x1xi32>
    %cst_11 = arith.constant 0.000000e+00 : f32
    %37 = vector.broadcast %cst_11 : f32 to vector<8x1xf32>
    %38 = arith.select %36, %30, %37 : vector<8x1xi1>, vector<8x1xf32>
    %39 = vector.shape_cast %38 : vector<8x1xf32> to vector<1x8x1xf32>
    %cst_12 = arith.constant dense<0.000000e+00> : vector<1xf32>
    %40 = vector.multi_reduction <add>, %39, %cst_12 [1, 2] : vector<1x8x1xf32> to vector<1xf32>
    %41 = vector.shape_cast %40 : vector<1xf32> to vector<1x1x1xf32>
    %42 = vector.extract %41[0, 0, 0] : f32 from vector<1x1x1xf32>
    %43 = vector.broadcast %42 : f32 to vector<1x8x128xf32>
    %c0_13 = arith.constant 0 : index
    %c0_14 = arith.constant 0 : index
    %c0_15 = arith.constant 0 : index
    %44 = vector.load %arg4[%c0_13, %c0_14, %c0_15] : memref<1x8x128xf32, #tpu.memory_space<vmem>>, vector<1x8x128xf32>
    tpu.vector_store %arg4[%c0_13, %c0_14, %c0_15], %43 {strides = array<i32>} : memref<1x8x128xf32, #tpu.memory_space<vmem>>, vector<1x8x128xf32>,
    return
  }
  func.func @transform_0(%arg0: i32) -> (i32, i32) {
    %c0_i32 = arith.constant 0 : i32
    %c0_i32_0 = arith.constant 0 : i32
    return %arg0, %c0_i32 : i32, i32
  }
  func.func @transform_1(%arg0: i32) -> (i32, i32) {
    %c0_i32 = arith.constant 0 : i32
    %c0_i32_0 = arith.constant 0 : i32
    return %arg0, %c0_i32 : i32, i32
  }
  func.func @transform_2(%arg0: i32) -> (i32, i32) {
    %c0_i32 = arith.constant 0 : i32
    %c0_i32_0 = arith.constant 0 : i32
    %c0_i32_1 = arith.constant 0 : i32
    return %c0_i32, %c0_i32_0 : i32, i32
  }
  func.func @transform_3(%arg0: i32) -> (i32, i32, i32) {
    %c0_i32 = arith.constant 0 : i32
    %c0_i32_0 = arith.constant 0 : i32
    %c0_i32_1 = arith.constant 0 : i32
    return %arg0, %c0_i32, %c0_i32_0 : i32, i32, i32
  }
}

</mosaic_0001>

<bundles_post_ra>
// kernel: tpu_custom_call.1
= control target key start
LH: loop header
LB: loop body
LE: loop exit
PB: predicated region body
PF: predicated region fallthrough
CT: control target
= control target key end

     0   :  { %vm16_vm0 = vcmask 261120   ;;  %s171_s0 = inlined_call_operand.vmem [shape: f32[8,32], index: 0, kind: input, shape index: {}]   ;;  %s172_s1 = inlined_call_operand.vmem [shape: s32[8,1], index: 1, kind: input, shape index: {}]   ;;  %s173_s2 = inlined_call_operand.vmem [shape: f32[1,32], index: 2, kind: input, shape index: {}]   ;;  %s174_s3 = inlined_call_operand.hbm [shape: f32[1,8,128], index: 3, kind: output, shape index: {}]  }
   0x1   :  { %v15_v0 = vld [vmem:[%s171_s0] sm:$0xff] }
   0x2   :  { %8 = vsyncpa [#allocation3], 0  ;;  %v17_v1 = vsel %vm16_vm0, %v15_v0, -inf  ;;  %v34_v2 = vld [vmem:[%s172_s1] sm:$0xff]  ;;  %v125_v3 = vmov 0   ;;  %v32_v9 = vlaneseq  ;;  %vm64_vm2 = vcmask 7168  }
   0x3   :  { %18 = vmax.xlane.f32.xlu0 %v17_v1  ;;  %95 = vset.pattern.permute.xlu1 %v125_v3  ;;  %v29_v12 = vld [vmem:[%s173_s2] sm:$0x1]  ;;  %s126_s1 = smov [#allocation2]  }
   0x4   :  { %96 = vset.pattern.permute.xlu0 %v125_v3  ;;  %36 = vperm.xlu1 %95, %v34_v2   ;;  %v41_v11 = vshrl.u32 %v32_v9, 7  ;;  %v30_v13 = vmul.f32 0.9, %v29_v12  ;;  %v31_v14 = vmul.f32 0.0032258064, %v29_v12  ;;  %v33_v16 = vand.u32 127, %v32_v9 }
   0x5   :  { %s83_s2 = sshll.u32 %s126_s1, 4  ;;  %s84_s2 = int_to_ptr.vmem [resolvable:$true] %s83_s2 }
   0x6   :  { %v42_v15 = vsub.s32 0, %v41_v11  ;;  %s101_s18 = scalar_lea.vmem %s84_s2, 128  ;;  %p106_p1 = scmp.lt.s32.totalorder %s84_s2, %s84_s2 }
   0x7   :  { %p102_p0 = scmp.ne.s32.totalorder %s84_s2, %s101_s18  ;;  %p107_p2 = scmp.lt.s32.totalorder %s101_s18, %s101_s18 }
   0x8   :  { %v43_v18 = vrot.slane %v30_v13, %v42_v15  ;;  %v49_v19 = vrot.slane %v31_v14, %v42_v15 }
   0x9   :  { %p108_p3 = por %p107_p2, %p106_p1 }
   0xb   :  { %p109_p4 = pnand %p108_p3, %p102_p0 }
  0x83   :  { %v37_v17 = vpop.permute.xlu1 %36 }
  0x84   :  { %vm38_vm1 = vcmp.eq.s32.totalorder %v33_v16, %v37_v17 }
  0x85   :  { %v51_v22 = vsel %vm38_vm1, %v43_v18, %v49_v19 }
  0x90   :  { %v19_v4 = vpop.xlane.xlu0 %18 }
  0x91   :  { %v20_v5 = vsub.f32 %v15_v0, %v19_v4 }
  0x93   :  { %v21_v6 = vmul.f32 1.442695, %v20_v5 }
  0x95   :  { %97 = vpow2.f32 %v21_v6 }
  0x9f   :  { %v98_v7 = vpop.eup %97 }
  0xa0   :  { %v23_v8 = vsel %vm16_vm0, %v98_v7, 0.0 }
  0xa1   :  { %24 = vadd.xlane.f32.xlu0 %v23_v8 }
 0x12e   :  { %v25_v10 = vpop.xlane.xlu0 %24 }
 0x12f   :  { %99 = vlog2.f32 %v25_v10 }
 0x139   :  { %v100_v20 = vpop.eup %99 }
 0x13a   :  { %v27_v21 = vmul.f32 0.6931472, %v100_v20 }
 0x13c   :  { %v28_v23 = vsub.f32 %v20_v5, %v27_v21 }
 0x13e   :  { %v52_v24 = vmul.f32 %v51_v22, %v28_v23 }
 0x140   :  { %v53_v25 = vsel %vm16_vm0, %v52_v24, 0.0 }
 0x141   :  { %54 = vadd.xlane.f32.xlu1 %v53_v25 }
 0x1ce   :  { %v55_v26 = vpop.xlane.xlu1 %54 }
 0x1cf   :  { %v56_v27 = vsub.f32 0.0, %v55_v26 }
 0x1d1   :  { %v65_v28 = vsel %vm64_vm2, %v56_v27, 0.0 }
 0x1d2   :  { %66 = vadd.xlane.f32.xlu0 %v65_v28 }
 0x25f   :  { %v67_v29 = vpop.xlane.xlu0 %66 }
 0x260   :  { %v68_v30 = vrot.slane %v67_v29, 4 }
 0x262   :  { %v69_v31 = vadd.f32 %v68_v30, %v67_v29 }
 0x264   :  { %v70_v32 = vrot.slane %v69_v31, 2 }
 0x266   :  { %v71_v33 = vadd.f32 %v70_v32, %v69_v31 }
 0x268   :  { %v72_v34 = vrot.slane %v71_v33, 1 }
 0x26a   :  { %v73_v35 = vadd.f32 %v72_v34, %v71_v33 }
 0x26c   :  { %91 = vpush %v73_v35 }
 0x29d   :  { %s92_s17 = spop %91 }
 0x29e   :  { %v75_v36 = vstv %s92_s17 }
 0x29f   :  { %76 = vst [vmem:[#allocation2] sm:$0xff] %v75_v36 }
 0x2a0   :  { %112 = shalt.err (!%p109_p4)
}
 0x2a1   :  { %s113_s21 = scalar_lea.hbm %s174_s3, 128 }
 0x2a2   :  { %p114_p5 = scmp.ne.s32.totalorder %s174_s3, %s113_s21  ;;  %p117_p6 = scmp.lt.u32.totalorder %s113_s21, %s174_s3 }
 0x2a4   :  { %p119_p7 = pnand %p117_p6, %p114_p5 }
 0x2a6   :  { %122 = shalt.err (!%p119_p7)
}
 0x2a7   :  { %86 = dma.vmem_to_hbm [thread:$0]  %s84_s2, 128, %s174_s3, [#allocation3]  }
 0x2a8   :  { %123 = dma.done.wait [#allocation3], 128  }
 0x2a9   :  { %124 = vsyncadd [#allocation3], 4294967168 }
 0x2aa   :  { %90 = vsyncpa [#allocation3], 1 }

</bundles_post_ra>
